<compile_context>
chip_gen: v6e
topology: v6e:2x2x1
jax: 0.10.0
libtpu: 0.0.40
codegen_flags: <defaults>
</compile_context>

<pallas_src>
import functools

import jax
import jax.numpy as jnp
from jax.experimental import pallas as pl
from jax.experimental.pallas import tpu as pltpu

LANE = 128          # TPU vreg lane width
SUBLANE_BF16 = 16   # bf16 packs 16 rows per sublane tile
MAX_TILE_B = 256    # batch tile for the grid path (fits any chip's VMEM easily)


def _round_up(x, m):
    return (x + m - 1) // m * m


def _fused_mlp_kernel(x_ref, w_ref, b_ref, o_ref, *, num_layers, activation, k_pad):
    """Entire MLP (input layer + hidden layers + output layer) for one batch tile.

    x_ref: (TILE_B, F_in)     f32  VMEM activations (unpadded last dim)
    w_ref: (L, K_pad, LANE)   bf16 VMEM weights, (in, out) layout, zero-padded
    b_ref: (L, 1, LANE)       f32  VMEM biases, zero-padded
    o_ref: (TILE_B, LANE)     f32  VMEM (only column 0 is the real output)
    """
    h = x_ref[...]                                     # (TB, F_in) f32
    f_in = h.shape[-1]
    if f_in < k_pad:                                   # static zero-extension
        h = jnp.concatenate(
            [h, jnp.zeros((h.shape[0], k_pad - f_in), h.dtype)], axis=-1)

    # L is tiny and static -> plain Python loop (fully unrolled at trace time).
    for li in range(num_layers):
        w = w_ref[li]                                  # (K_pad, LANE) bf16
        b = b_ref[li]                                  # (1, LANE)     f32
        # bf16 MXU inputs, f32 accumulate; bias add + activation stay in f32.
        y = jnp.dot(h[:, :k_pad].astype(jnp.bfloat16), w,
                    preferred_element_type=jnp.float32) + b
        if li < num_layers - 1:                        # output layer stays linear
            if activation == "relu":
                y = jnp.maximum(y, 0.0)
            else:                                      # sigmoid -> EUP slot
                y = jax.nn.sigmoid(y)
        h = y                                          # (TB, LANE) f32
    o_ref[...] = h.astype(o_ref.dtype)


def init_params(key, num_inputs, num_hidden_layers, nodes_per_hidden_layer):
    """PyTorch-style uniform(-1/sqrt(fan_in), 1/sqrt(fan_in)) init.

    Weights stored (in_features, out_features) = transposed vs nn.Linear.
    """
    dims = (
        [(num_inputs, nodes_per_hidden_layer)]
        + [(nodes_per_hidden_layer, nodes_per_hidden_layer)] * num_hidden_layers
        + [(nodes_per_hidden_layer, 1)]
    )
    params = []
    for li, (fin, fout) in enumerate(dims):
        kw, kb = jax.random.split(jax.random.fold_in(key, li))
        bound = 1.0 / (fin ** 0.5)
        w = jax.random.uniform(kw, (fin, fout), jnp.float32, -bound, bound)
        b = jax.random.uniform(kb, (fout,), jnp.float32, -bound, bound)
        params.append((w, b))
    return params


def pack_params(params):
    """Pack ONCE at setup: bf16 weights (L, K_pad, 128) with fan-in padded only
    to the bf16 sublane multiple (16), fan-out lane-padded to 128; f32 biases."""
    L = len(params)
    k_pad = max(_round_up(w.shape[0], SUBLANE_BF16) for w, _ in params)
    w_stack = jnp.zeros((L, k_pad, LANE), jnp.bfloat16)
    b_stack = jnp.zeros((L, 1, LANE), jnp.float32)
    for li, (w, b) in enumerate(params):
        fin, fout = w.shape
        assert fin <= k_pad and fout <= LANE, "layer wider than 128 not supported"
        w_stack = w_stack.at[li, :fin, :fout].set(w.astype(jnp.bfloat16))
        b_stack = b_stack.at[li, 0, :fout].set(b)
    return w_stack, b_stack


@functools.partial(jax.jit, static_argnames=("output_type",))
def custom_model_forward(x, w_stack, b_stack, output_type):
    """Mirror of CustomModel.forward: act(in) -> act(hidden)* -> linear out."""
    B, F_in = x.shape
    L, K_pad, P = w_stack.shape
    assert P == LANE

    # Small batch: one block, no padding, no extra wrapper ops.
    # Large batch: 256-row tiles on a "parallel" grid (both TCs on v7x),
    # weights/biases VMEM-resident across iterations.
    if B <= MAX_TILE_B:
        tile_b, b_pad, x_in = B, B, x
    else:
        tile_b = MAX_TILE_B
        b_pad = _round_up(B, tile_b)
        x_in = jnp.pad(x, ((0, b_pad - B), (0, 0))) if b_pad != B else x

    act = "relu" if output_type == "relu" else "sigmoid"
    kernel = functools.partial(
        _fused_mlp_kernel, num_layers=L, activation=act, k_pad=K_pad)

    out_pad = pl.pallas_call(
        kernel,
        out_shape=jax.ShapeDtypeStruct((b_pad, LANE), jnp.float32),
        grid=(b_pad // tile_b,),
        in_specs=[
            pl.BlockSpec((tile_b, F_in), lambda i: (i, 0)),
            pl.BlockSpec((L, K_pad, LANE), lambda i: (0, 0, 0)),  # resident
            pl.BlockSpec((L, 1, LANE), lambda i: (0, 0, 0)),      # resident
        ],
        out_specs=pl.BlockSpec((tile_b, LANE), lambda i: (i, 0)),
        compiler_params=pltpu.CompilerParams(
            dimension_semantics=("parallel",)),
    )(x_in, w_stack, b_stack)

    # Slice the real (B, 1) result back out of the lane-dense slab.
    return out_pad[:B, :1]


def ref_forward_f32(x, params, output_type):
    """Plain-JAX f32 reference (same math as the PyTorch module)."""
    act = (lambda v: jnp.maximum(v, 0.0)) if output_type == "relu" else jax.nn.sigmoid
    h = x
    for w, b in params[:-1]:
        h = act(h @ w + b)
    w_out, b_out = params[-1]
    return h @ w_out + b_out


def ref_forward_bf16(x, params, output_type):
    """Reference with the kernel's numerics: bf16 MXU operands, f32 accumulate,
    f32 bias/activation."""
    act = (lambda v: jnp.maximum(v, 0.0)) if output_type == "relu" else jax.nn.sigmoid
    h = x
    for li, (w, b) in enumerate(params):
        y = jnp.dot(h.astype(jnp.bfloat16), w.astype(jnp.bfloat16),
                    preferred_element_type=jnp.float32) + b
        h = y if li == len(params) - 1 else act(y)
    return h


if __name__ == "__main__":
    # Small shapes consistent with the module:
    # batch=8, num_inputs=32, 2 hidden layers of 32 nodes, scalar output.
    batch = 8
    num_inputs = 32
    num_hidden_layers = 2
    nodes_per_hidden_layer = 32

    key = jax.random.PRNGKey(0)
    k_x, k_p, k_xl = jax.random.split(key, 3)
    x = jax.random.normal(k_x, (batch, num_inputs), dtype=jnp.float32)
    params = init_params(k_p, num_inputs, num_hidden_layers, nodes_per_hidden_layer)
    w_stack, b_stack = pack_params(params)

    ok = True
    for output_type in ("relu", "sigmoid"):   # exercise both activation paths
        out = custom_model_forward(x, w_stack, b_stack, output_type)
        jax.block_until_ready(out)
        assert out.shape == (batch, 1), out.shape
        # Tight check vs a reference using the same bf16-operand numerics.
        ok &= bool(jnp.allclose(out, ref_forward_bf16(x, params, output_type),
                                atol=1e-4, rtol=1e-4))
        # Loose sanity check vs the pure-f32 PyTorch-equivalent math.
        ok &= bool(jnp.allclose(out, ref_forward_f32(x, params, output_type),
                                atol=2e-2, rtol=2e-2))

    # Also exercise the batch-grid ("parallel") path with ragged padding.
    big_batch = 300
    x_big = jax.random.normal(k_xl, (big_batch, num_inputs), dtype=jnp.float32)
    out_big = custom_model_forward(x_big, w_stack, b_stack, "relu")
    jax.block_until_ready(out_big)
    assert out_big.shape == (big_batch, 1), out_big.shape
    ok &= bool(jnp.allclose(out_big, ref_forward_bf16(x_big, params, "relu"),
                            atol=1e-4, rtol=1e-4))

    assert ok
    print("KERNEL_OK")
</pallas_src>

<mosaic_0001>
module attributes {stable_mosaic.version = 11 : i64} {
  func.func @_fused_mlp_kernel(%arg0: i32, %arg1: memref<8x32xf32, #tpu.memory_space<vmem>>, %arg2: memref<4x32x128xbf16, #tpu.memory_space<vmem>>, %arg3: memref<4x1x128xf32, #tpu.memory_space<vmem>>, %arg4: memref<8x128xf32, #tpu.memory_space<vmem>>) attributes {dimension_semantics = [#tpu.dimension_semantics<parallel>], iteration_bounds = array<i64: 1>, scalar_prefetch = 0 : i64, scratch_operands = 0 : i64, tpu.core_type = #tpu.core_type<tc>, window_params = [{transform_indices = @transform_0, window_bounds = array<i64: 8, 32>}, {pipeline_mode = #tpu.pipeline_mode<synchronous>, transform_indices = @transform_1, window_bounds = array<i64: 4, 32, 128>}, {pipeline_mode = #tpu.pipeline_mode<synchronous>, transform_indices = @transform_2, window_bounds = array<i64: 4, 1, 128>}, {transform_indices = @transform_3, window_bounds = array<i64: 8, 128>}]} {
    %c0 = arith.constant 0 : index
    %c0_0 = arith.constant 0 : index
    %0 = vector.load %arg1[%c0, %c0_0] : memref<8x32xf32, #tpu.memory_space<vmem>>, vector<8x32xf32>
    %c0_1 = arith.constant 0 : index
    %c0_2 = arith.constant 0 : index
    %c0_3 = arith.constant 0 : index
    %1 = vector.load %arg2[%c0_1, %c0_2, %c0_3] : memref<4x32x128xbf16, #tpu.memory_space<vmem>>, vector<1x32x128xbf16>
    %2 = vector.shape_cast %1 : vector<1x32x128xbf16> to vector<32x128xbf16>
    %c0_4 = arith.constant 0 : index
    %c0_5 = arith.constant 0 : index
    %c0_6 = arith.constant 0 : index
    %3 = vector.load %arg3[%c0_4, %c0_5, %c0_6] : memref<4x1x128xf32, #tpu.memory_space<vmem>>, vector<1x1x128xf32>
    %4 = vector.shape_cast %3 : vector<1x1x128xf32> to vector<1x128xf32>
    %5 = arith.truncf %0 : vector<8x32xf32> to vector<8x32xbf16>
    %cst = arith.constant dense<0.000000e+00> : vector<8x128xf32>
    %6 = tpu.matmul %5, %2, %cst {dimension_numbers = #tpu.dot_dimension_numbers<[1], [0], [0], [1], [0, 0, 1, 1], [], []>} : vector<8x32xbf16>, vector<32x128xbf16>, vector<8x128xf32> -> vector<8x128xf32>
    %7 = vector.broadcast %4 : vector<1x128xf32> to vector<8x128xf32>
    %8 = arith.addf %6, %7 : vector<8x128xf32>
    %cst_7 = arith.constant 0.000000e+00 : f32
    %9 = vector.broadcast %cst_7 : f32 to vector<8x128xf32>
    %10 = arith.maximumf %8, %9 : vector<8x128xf32>
    %c1 = arith.constant 1 : index
    %c0_8 = arith.constant 0 : index
    %c0_9 = arith.constant 0 : index
    %11 = vector.load %arg2[%c1, %c0_8, %c0_9] : memref<4x32x128xbf16, #tpu.memory_space<vmem>>, vector<1x32x128xbf16>
    %12 = vector.shape_cast %11 : vector<1x32x128xbf16> to vector<32x128xbf16>
    %c1_10 = arith.constant 1 : index
    %c0_11 = arith.constant 0 : index
    %c0_12 = arith.constant 0 : index
    %13 = vector.load %arg3[%c1_10, %c0_11, %c0_12] : memref<4x1x128xf32, #tpu.memory_space<vmem>>, vector<1x1x128xf32>
    %14 = vector.shape_cast %13 : vector<1x1x128xf32> to vector<1x128xf32>
    %15 = vector.extract_strided_slice %10 {offsets = [0, 0], sizes = [8, 32], strides = [1, 1]} : vector<8x128xf32> to vector<8x32xf32>
    %16 = arith.truncf %15 : vector<8x32xf32> to vector<8x32xbf16>
    %cst_13 = arith.constant dense<0.000000e+00> : vector<8x128xf32>
    %17 = tpu.matmul %16, %12, %cst_13 {dimension_numbers = #tpu.dot_dimension_numbers<[1], [0], [0], [1], [0, 0, 1, 1], [], []>} : vector<8x32xbf16>, vector<32x128xbf16>, vector<8x128xf32> -> vector<8x128xf32>
    %18 = vector.broadcast %14 : vector<1x128xf32> to vector<8x128xf32>
    %19 = arith.addf %17, %18 : vector<8x128xf32>
    %cst_14 = arith.constant 0.000000e+00 : f32
    %20 = vector.broadcast %cst_14 : f32 to vector<8x128xf32>
    %21 = arith.maximumf %19, %20 : vector<8x128xf32>
    %c2 = arith.constant 2 : index
    %c0_15 = arith.constant 0 : index
    %c0_16 = arith.constant 0 : index
    %22 = vector.load %arg2[%c2, %c0_15, %c0_16] : memref<4x32x128xbf16, #tpu.memory_space<vmem>>, vector<1x32x128xbf16>
    %23 = vector.shape_cast %22 : vector<1x32x128xbf16> to vector<32x128xbf16>
    %c2_17 = arith.constant 2 : index
    %c0_18 = arith.constant 0 : index
    %c0_19 = arith.constant 0 : index
    %24 = vector.load %arg3[%c2_17, %c0_18, %c0_19] : memref<4x1x128xf32, #tpu.memory_space<vmem>>, vector<1x1x128xf32>
    %25 = vector.shape_cast %24 : vector<1x1x128xf32> to vector<1x128xf32>
    %26 = vector.extract_strided_slice %21 {offsets = [0, 0], sizes = [8, 32], strides = [1, 1]} : vector<8x128xf32> to vector<8x32xf32>
    %27 = arith.truncf %26 : vector<8x32xf32> to vector<8x32xbf16>
    %cst_20 = arith.constant dense<0.000000e+00> : vector<8x128xf32>
    %28 = tpu.matmul %27, %23, %cst_20 {dimension_numbers = #tpu.dot_dimension_numbers<[1], [0], [0], [1], [0, 0, 1, 1], [], []>} : vector<8x32xbf16>, vector<32x128xbf16>, vector<8x128xf32> -> vector<8x128xf32>
    %29 = vector.broadcast %25 : vector<1x128xf32> to vector<8x128xf32>
    %30 = arith.addf %28, %29 : vector<8x128xf32>
    %cst_21 = arith.constant 0.000000e+00 : f32
    %31 = vector.broadcast %cst_21 : f32 to vector<8x128xf32>
    %32 = arith.maximumf %30, %31 : vector<8x128xf32>
    %c3 = arith.constant 3 : index
    %c0_22 = arith.constant 0 : index
    %c0_23 = arith.constant 0 : index
    %33 = vector.load %arg2[%c3, %c0_22, %c0_23] : memref<4x32x128xbf16, #tpu.memory_space<vmem>>, vector<1x32x128xbf16>
    %34 = vector.shape_cast %33 : vector<1x32x128xbf16> to vector<32x128xbf16>
    %c3_24 = arith.constant 3 : index
    %c0_25 = arith.constant 0 : index
    %c0_26 = arith.constant 0 : index
    %35 = vector.load %arg3[%c3_24, %c0_25, %c0_26] : memref<4x1x128xf32, #tpu.memory_space<vmem>>, vector<1x1x128xf32>
    %36 = vector.shape_cast %35 : vector<1x1x128xf32> to vector<1x128xf32>
    %37 = vector.extract_strided_slice %32 {offsets = [0, 0], sizes = [8, 32], strides = [1, 1]} : vector<8x128xf32> to vector<8x32xf32>
    %38 = arith.truncf %37 : vector<8x32xf32> to vector<8x32xbf16>
    %cst_27 = arith.constant dense<0.000000e+00> : vector<8x128xf32>
    %39 = tpu.matmul %38, %34, %cst_27 {dimension_numbers = #tpu.dot_dimension_numbers<[1], [0], [0], [1], [0, 0, 1, 1], [], []>} : vector<8x32xbf16>, vector<32x128xbf16>, vector<8x128xf32> -> vector<8x128xf32>
    %40 = vector.broadcast %36 : vector<1x128xf32> to vector<8x128xf32>
    %41 = arith.addf %39, %40 : vector<8x128xf32>
    %c0_28 = arith.constant 0 : index
    %c0_29 = arith.constant 0 : index
    %42 = vector.load %arg4[%c0_28, %c0_29] : memref<8x128xf32, #tpu.memory_space<vmem>>, vector<8x128xf32>
    tpu.vector_store %arg4[%c0_28, %c0_29], %41 {strides = array<i32>} : memref<8x128xf32, #tpu.memory_space<vmem>>, vector<8x128xf32>,
    return
  }
  func.func @transform_0(%arg0: i32) -> (i32, i32) {
    %c0_i32 = arith.constant 0 : i32
    %c0_i32_0 = arith.constant 0 : i32
    return %arg0, %c0_i32 : i32, i32
  }
  func.func @transform_1(%arg0: i32) -> (i32, i32, i32) {
    %c0_i32 = arith.constant 0 : i32
    %c0_i32_0 = arith.constant 0 : i32
    %c0_i32_1 = arith.constant 0 : i32
    %c0_i32_2 = arith.constant 0 : i32
    return %c0_i32, %c0_i32_0, %c0_i32_1 : i32, i32, i32
  }
  func.func @transform_2(%arg0: i32) -> (i32, i32, i32) {
    %c0_i32 = arith.constant 0 : i32
    %c0_i32_0 = arith.constant 0 : i32
    %c0_i32_1 = arith.constant 0 : i32
    %c0_i32_2 = arith.constant 0 : i32
    return %c0_i32, %c0_i32_0, %c0_i32_1 : i32, i32, i32
  }
  func.func @transform_3(%arg0: i32) -> (i32, i32) {
    %c0_i32 = arith.constant 0 : i32
    %c0_i32_0 = arith.constant 0 : i32
    return %arg0, %c0_i32 : i32, i32
  }
}

</mosaic_0001>

<bundles_post_ra>
// kernel: custom_model_forward.1
= control target key start
LH: loop header
LB: loop body
LE: loop exit
PB: predicated region body
PF: predicated region fallthrough
CT: control target
= control target key end

     0   :  { %8 = vsyncpa [#allocation3], 0  ;;  %s530_s0 = inlined_call_operand.hbm [shape: f32[8,32], index: 0, kind: input, shape index: {}]   ;;  %s531_s1 = inlined_call_operand.hbm [shape: bf16[4,32,128], index: 1, kind: input, shape index: {}]   ;;  %s532_s2 = inlined_call_operand.hbm [shape: f32[4,1,128], index: 2, kind: input, shape index: {}]   ;;  %s533_s3 = inlined_call_operand.vmem [shape: f32[8,128], index: 3, kind: output, shape index: {}]  }
   0x1   :  { %9 = vsyncpa [#allocation5], 0  ;;  %s481_s12 = smov [#allocation4]  }
   0x2   :  { %s25_s13 = sshll.u32 %s481_s12, 4  ;;  %s26_s13 = int_to_ptr.vmem [resolvable:$true] %s25_s13 }
   0x3   :  { %s425_s14 = scalar_lea.vmem %s26_s13, 1024  ;;  %p430_p1 = scmp.lt.s32.totalorder %s26_s13, %s26_s13 }
   0x4   :  { %p426_p0 = scmp.ne.s32.totalorder %s26_s13, %s425_s14  ;;  %p431_p2 = scmp.lt.s32.totalorder %s425_s14, %s425_s14 }
   0x6   :  { %p432_p3 = por %p431_p2, %p430_p1 }
   0x8   :  { %p433_p4 = pnand %p432_p3, %p426_p0 }
   0xa   :  { %436 = shalt.err (!%p433_p4)
}
   0xb   :  { %s482_s15 = smov 64   ;;  %s483_s16 = smov 4  }
   0xc   :  { %31 = dma.hbm_to_vmem [thread:$0]  %s531_s1, 1024, %s26_s13, [#allocation5], %s482_s15, %s482_s15, %s483_s16  }
   0xd   :  { %s484_s19 = smov [#allocation2]   ;;  %s485_s21 = smov [#allocation6]  }
   0xe   :  { %s16_s20 = sshll.u32 %s484_s19, 4  ;;  %s37_s22 = sshll.u32 %s485_s21, 4  ;;  %s17_s20 = int_to_ptr.vmem [resolvable:$true] %s16_s20  ;;  %s38_s22 = int_to_ptr.vmem [resolvable:$true] %s37_s22 }
   0xf   :  { %s445_s23 = scalar_lea.vmem %s17_s20, 128  ;;  %p450_p6 = scmp.lt.s32.totalorder %s17_s20, %s17_s20 }
  0x10   :  { %p446_p5 = scmp.ne.s32.totalorder %s17_s20, %s445_s23  ;;  %p451_p7 = scmp.lt.s32.totalorder %s445_s23, %s445_s23 }
  0x12   :  { %p452_p8 = por %p451_p7, %p450_p6 }
  0x14   :  { %p453_p9 = pnand %p452_p8, %p446_p5 }
  0x16   :  { %456 = shalt.err (!%p453_p9)
}
  0x17   :  { %19 = dma.hbm_to_vmem [thread:$0]  %s530_s0, 128, %s17_s20, [#allocation3]  }
  0x18   :  { %s465_s26 = scalar_lea.vmem %s38_s22, 64  ;;  %p470_p11 = scmp.lt.s32.totalorder %s38_s22, %s38_s22 }
  0x19   :  { %p466_p10 = scmp.ne.s32.totalorder %s38_s22, %s465_s26  ;;  %p471_p12 = scmp.lt.s32.totalorder %s465_s26, %s465_s26 }
  0x1b   :  { %p472_p13 = por %p471_p12, %p470_p11 }
  0x1d   :  { %p473_p0 = pnand %p472_p13, %p466_p10 }
  0x1f   :  { %476 = shalt.err (!%p473_p0)
}
  0x20   :  { %s486_s1 = smov 16   ;;  %s487_s27 = smov 1  }
  0x21   :  { %43 = dma.hbm_to_vmem [thread:$0]  %s532_s2, 64, %s38_s22, [#allocation5], %s486_s1, %s486_s1, %s487_s27  }
  0x22   :  { %477 = dma.done.wait [#allocation3], 128  }
  0x23   :  { %478 = vsyncadd [#allocation3], 4294967168 }
  0x24   :  { %479 = dma.done.wait [#allocation5], 1088  }
  0x25   :  { %480 = vsyncadd [#allocation5], 4294966208  ;;  %v488_v0 = vmov 0.0   ;;  %vm489_vm0 = vmmov 0   ;;  %v409_v1 = vld [vmem:[#allocation4 + $0x8] sm:$0xff]   ;;  %v410_v2 = vld [vmem:[#allocation4] sm:$0xff]  }
  0x26   :  { %368 = vmatprep.subr.bf16.mxu0 %v488_v0  ;;  %372 = vmatprep.mubr.msk.bf16.mxu0 %vm489_vm0, %v488_v0  ;;  %v54_v3 = vld [vmem:[#allocation2] sm:$0xff]  ;;  %vm79_vm1 = vcmask 261120   ;;  %v412_v6 = vld [vmem:[#allocation4 + $0x10] sm:$0xff]   ;;  %v413_v7 = vld [vmem:[#allocation4 + $0x28] sm:$0xff]  }
  0x27   :  { %376 = vmatprep.subr.bf16.mxu1 %v488_v0  ;;  %380 = vmatprep.mubr.msk.bf16.mxu1 %vm489_vm0, %v488_v0  ;;  %v60_v4 = vpack.c.bf16 %v54_v3, %v54_v3  ;;  %v411_v5 = vld [vmem:[#allocation4 + $0x18] sm:$0xff]   ;;  %v340_v8 = vld [vmem:[#allocation6] ss:$0 sm:$0xff]  ;;  %v344_v18 = vld [vmem:[#allocation6 + $0x1] ss:$0 sm:$0xff] }
  0x28   :  { %369 = vmatpush3.bf16.msra.mxu0 %v409_v1  ;;  %377 = vmatpush3.bf16.msra.mxu1 %v411_v5  ;;  %v414_v16 = vld [vmem:[#allocation4 + $0x20] sm:$0xff]   ;;  %v415_v17 = vld [vmem:[#allocation4 + $0x38] sm:$0xff]   ;;  %v416_v26 = vld [vmem:[#allocation4 + $0x30] sm:$0xff]  }
  0x29   :  { %370 = vmatprep.subr.bf16.mxu0 %v488_v0  ;;  %378 = vmatprep.subr.bf16.mxu1 %v488_v0  ;;  %v348_v27 = vld [vmem:[#allocation6 + $0x2] ss:$0 sm:$0xff]  ;;  %v352_v35 = vld [vmem:[#allocation6 + $0x3] ss:$0 sm:$0xff] }
  0x2c   :  { %371 = vmatpush3.bf16.msra.mxu0 %v410_v2  ;;  %379 = vmatpush3.bf16.msra.mxu1 %v412_v6 }
  0x2d   :  { %384 = vmatprep.subr.bf16.mxu0 %v488_v0  ;;  %392 = vmatprep.subr.bf16.mxu1 %v488_v0 }
  0x2f   :  { %373 = vmatmul.mubr.msk.bf16.vlgmr.msra.gmra.mxu0 %vm79_vm1, %v60_v4 }
  0x30   :  { %388 = vmatprep.mubr.msk.bf16.mxu0 %vm489_vm0, %v488_v0  ;;  %385 = vmatpush3.bf16.msra.mxu0 %v413_v7 }
  0x31   :  { %386 = vmatprep.subr.bf16.mxu0 %v488_v0 }
  0x34   :  { %387 = vmatpush3.bf16.msra.mxu0 %v414_v16 }
  0xef   :  { %v117_v9 = vpop.f32.mrf.mxu0 }
  0xf0   :  { %v118_v10 = vadd.f32 %v340_v8, %v117_v9 }
  0xf1   :  { %v374_v11 = vpop.f32.mrf.mxu0 }
  0xf2   :  { %v123_v12 = vmax.f32 %v118_v10, 0.0 }
  0xf3   :  { %v120_v13 = vpop.f32.mrf.mxu0 }
  0xf4   :  { %v131_v14 = vpack.c.bf16 %v123_v12, %v123_v12 }
  0xf5   :  { %v375_v15 = vpop.f32.mrf.mxu0 }
  0xf6   :  { %381 = vmatmul.mubr.msk.bf16.vlgmr.msra.gmra.mxu1 %vm79_vm1, %v131_v14 }
  0xf7   :  { %396 = vmatprep.mubr.msk.bf16.mxu1 %vm489_vm0, %v488_v0  ;;  %393 = vmatpush3.bf16.msra.mxu1 %v415_v17 }
  0xf8   :  { %394 = vmatprep.subr.bf16.mxu1 %v488_v0 }
  0xfb   :  { %395 = vmatpush3.bf16.msra.mxu1 %v416_v26 }
 0x1b6   :  { %v187_v19 = vpop.f32.mrf.mxu1 }
 0x1b7   :  { %v188_v20 = vadd.f32 %v344_v18, %v187_v19 }
 0x1b8   :  { %v382_v21 = vpop.f32.mrf.mxu1 }
 0x1b9   :  { %v193_v22 = vmax.f32 %v188_v20, 0.0 }
 0x1ba   :  { %v190_v23 = vpop.f32.mrf.mxu1 }
 0x1bb   :  { %v201_v24 = vpack.c.bf16 %v193_v22, %v193_v22 }
 0x1bc   :  { %v383_v25 = vpop.f32.mrf.mxu1 }
 0x1bd   :  { %389 = vmatmul.mubr.msk.bf16.vlgmr.msra.gmra.mxu0 %vm79_vm1, %v201_v24 }
 0x27d   :  { %v257_v28 = vpop.f32.mrf.mxu0 }
 0x27e   :  { %v258_v29 = vadd.f32 %v348_v27, %v257_v28 }
 0x27f   :  { %v390_v30 = vpop.f32.mrf.mxu0 }
 0x280   :  { %v263_v31 = vmax.f32 %v258_v29, 0.0 }
 0x281   :  { %v260_v32 = vpop.f32.mrf.mxu0 }
 0x282   :  { %v271_v33 = vpack.c.bf16 %v263_v31, %v263_v31 }
 0x283   :  { %v391_v34 = vpop.f32.mrf.mxu0 }
 0x284   :  { %397 = vmatmul.mubr.msk.bf16.vlgmr.msra.gmra.mxu1 %vm79_vm1, %v271_v33 }
 0x344   :  { %v327_v36 = vpop.f32.mrf.mxu1 }
 0x345   :  { %v328_v37 = vadd.f32 %v352_v35, %v327_v36 }
 0x346   :  { %v398_v38 = vpop.f32.mrf.mxu1 }
 0x347   :  { %333 = vst [vmem:[%s533_s3] sm:$0xff] %v328_v37 }
 0x348   :  { %v330_v39 = vpop.f32.mrf.mxu1 }
 0x34a   :  { %v399_v40 = vpop.f32.mrf.mxu1 }
 0x34b   :  { %338 = vsyncpa [#allocation3], 1 }
 0x34c   :  { %339 = vsyncpa [#allocation5], 1 }

</bundles_post_ra>
